<compile_context>
chip_gen: v7x
topology: tpu7x:2x2x1
jax: 0.10.0
libtpu: 0.0.40
codegen_flags: <defaults>
</compile_context>

<pallas_src>
import jax
import jax.numpy as jnp
from jax.experimental import pallas as pl
from jax.experimental.pallas import tpu as pltpu


def _round_up(a, b):
    return -(-a // b) * b


def _gemm_bias_kernel(p_ref, w_ref, b_ref, o_ref):
    """One grid step: (M_TILE, K_p) x (K_p, CO_TILE) + bias.

    p_ref: (M_TILE, K_p)    im2col patches (lane-dense K, zero-padded)
    w_ref: (K_p, CO_TILE)   tap-ordered weight with BN scale folded in
    b_ref: (1, CO_TILE)     folded BN bias (beta - mean*scale), zero-padded
    o_ref: (M_TILE, CO_TILE)
    """
    acc = jnp.dot(p_ref[...], w_ref[...], preferred_element_type=jnp.float32)
    o_ref[...] = (acc + b_ref[...]).astype(o_ref.dtype)


def basic_conv2d(x_nchw, weight_oihw, gamma, beta, running_mean, running_var,
                 *, stride=1, padding=0, eps=1e-5, mxu_dtype=None):
    """Conv2d(bias=False, groups=1, dilation=1) + BatchNorm2d (eval), NCHW in/out."""
    N, Cin, H, W = x_nchw.shape
    Cout, Cin_w, KH, KW = weight_oihw.shape
    assert Cin_w == Cin, "groups > 1 not supported"
    Ho = (H + 2 * padding - KH) // stride + 1
    Wo = (W + 2 * padding - KW) // stride + 1

    LANE = 128
    K = KH * KW * Cin
    M = N * Ho * Wo
    K_p = _round_up(K, LANE)
    Cout_p = _round_up(Cout, LANE)
    # 2x256 MXU on v6e/v7x; 128 would be equally good on v5e (4x128 MXU).
    CO_TILE = 256 if Cout_p % 256 == 0 else LANE

    compute_dtype = jnp.dtype(mxu_dtype) if mxu_dtype is not None else jnp.dtype(x_nchw.dtype)
    out_dtype = jnp.dtype(x_nchw.dtype)
    in_isz = compute_dtype.itemsize
    out_isz = out_dtype.itemsize

    # --- M tile: up to 512 rows (multiple of 8), shrink until the
    # double-buffered working set fits a conservative VMEM budget.
    M_TILE = min(512, _round_up(M, 8))

    def vmem_estimate(mt):
        return (2 * mt * K_p * in_isz            # patch tile (double buffered)
                + 2 * K_p * CO_TILE * in_isz     # weight slab
                + 2 * CO_TILE * 4                # bias
                + 2 * mt * CO_TILE * out_isz)    # output tile

    VMEM_BUDGET = 48 * 1024 * 1024               # v7x: 64 MiB physical per TC
    while M_TILE > 64 and vmem_estimate(M_TILE) > VMEM_BUDGET:
        M_TILE = _round_up(M_TILE // 2, 8)
    M_p = _round_up(M, M_TILE)
    vmem_limit = max(32 << 20,
                     min(int(vmem_estimate(M_TILE) * 1.5) + (4 << 20), 100 << 20))

    # --- wrapper-side im2col (plain XLA strided slices; handles stride) ------
    x = jnp.transpose(x_nchw, (0, 2, 3, 1))                        # NCHW -> NHWC
    if padding:
        x = jnp.pad(x, ((0, 0), (padding, padding), (padding, padding), (0, 0)))
    taps = []
    for kh in range(KH):
        for kw in range(KW):
            taps.append(x[:,
                          kh:kh + (Ho - 1) * stride + 1:stride,
                          kw:kw + (Wo - 1) * stride + 1:stride,
                          :])
    # Tap order (kh, kw, cin) matches the weight transpose below.
    patches = jnp.concatenate(taps, axis=-1).reshape(M, K).astype(compute_dtype)
    patches = jnp.pad(patches, ((0, M_p - M), (0, K_p - K)))

    # --- weight + folded BatchNorm -------------------------------------------
    scale = gamma / jnp.sqrt(running_var + eps)                    # (Cout,)
    bias = beta - running_mean * scale                             # (Cout,)
    w = jnp.transpose(weight_oihw, (2, 3, 1, 0)).reshape(K, Cout)  # (kh,kw,cin) x Cout
    w = (w * scale[None, :]).astype(compute_dtype)                 # fold BN scale
    w = jnp.pad(w, ((0, K_p - K), (0, Cout_p - Cout)))
    bias_p = jnp.pad(bias, (0, Cout_p - Cout)).reshape(1, Cout_p).astype(jnp.float32)

    # co outer, m inner: the weight tile index is constant across the inner m
    # steps so it stays resident while patch tiles stream through.
    grid = (Cout_p // CO_TILE, M_p // M_TILE)

    flops = 2 * M * K * Cout
    bytes_accessed = (patches.size * patches.dtype.itemsize
                      + w.size * w.dtype.itemsize
                      + bias_p.size * 4
                      + M_p * Cout_p * out_isz)

    out_flat = pl.pallas_call(
        _gemm_bias_kernel,
        out_shape=jax.ShapeDtypeStruct((M_p, Cout_p), out_dtype),
        grid=grid,
        in_specs=[
            pl.BlockSpec((M_TILE, K_p), lambda co, m: (m, 0)),
            pl.BlockSpec((K_p, CO_TILE), lambda co, m: (0, co)),
            pl.BlockSpec((1, CO_TILE), lambda co, m: (0, co)),
        ],
        out_specs=pl.BlockSpec((M_TILE, CO_TILE), lambda co, m: (m, co)),
        compiler_params=pltpu.CompilerParams(
            dimension_semantics=("parallel", "parallel"),
            vmem_limit_bytes=vmem_limit),
        cost_estimate=pl.CostEstimate(flops=flops, transcendentals=0,
                                      bytes_accessed=bytes_accessed),
    )(patches, w, bias_p)

    # Drop M/channel padding, un-flatten, NHWC -> NCHW.
    out = out_flat[:M, :Cout].reshape(N, Ho, Wo, Cout)
    return jnp.transpose(out, (0, 3, 1, 2))


if __name__ == "__main__":
    key = jax.random.PRNGKey(0)

    def make_inputs(k, N, Cin, H, W, Cout, K):
        kx, kw, kg, kb, km, kv = jax.random.split(k, 6)
        x = jax.random.normal(kx, (N, Cin, H, W), dtype=jnp.float32)
        weight = jax.random.normal(kw, (Cout, Cin, K, K), dtype=jnp.float32) * 0.1
        gamma = 1.0 + 0.1 * jax.random.normal(kg, (Cout,), dtype=jnp.float32)
        beta = 0.1 * jax.random.normal(kb, (Cout,), dtype=jnp.float32)
        rm = 0.2 * jax.random.normal(km, (Cout,), dtype=jnp.float32)
        rv = 0.5 + jnp.abs(jax.random.normal(kv, (Cout,), dtype=jnp.float32)) * 0.5
        return x, weight, gamma, beta, rm, rv

    def reference(x, weight, gamma, beta, rm, rv, stride, padding, eps):
        conv = jax.lax.conv_general_dilated(
            x, weight, window_strides=(stride, stride),
            padding=((padding, padding), (padding, padding)),
            dimension_numbers=("NCHW", "OIHW", "NCHW"))
        return ((conv - rm[None, :, None, None])
                / jnp.sqrt(rv[None, :, None, None] + eps)
                * gamma[None, :, None, None] + beta[None, :, None, None])

    eps = 1e-5
    k1, k2 = jax.random.split(key)

    # Case 1: BasicConv2d(in_planes=4, out_planes=8, kernel_size=3, padding=1).
    args1 = make_inputs(k1, 2, 4, 16, 16, 8, 3)
    out1 = jax.block_until_ready(basic_conv2d(*args1, stride=1, padding=1, eps=eps))
    ref1 = reference(*args1, 1, 1, eps)
    assert out1.shape == (2, 8, 16, 16)
    assert jnp.allclose(out1, ref1, atol=1e-4, rtol=1e-4), "case 1 mismatch"

    # Case 2: stride-2, no padding (exercises wrapper-side strided patch slices).
    args2 = make_inputs(k2, 2, 4, 16, 16, 16, 3)
    out2 = jax.block_until_ready(basic_conv2d(*args2, stride=2, padding=0, eps=eps))
    ref2 = reference(*args2, 2, 0, eps)
    assert out2.shape == ref2.shape
    assert jnp.allclose(out2, ref2, atol=1e-4, rtol=1e-4), "case 2 mismatch"

    print("KERNEL_OK")
</pallas_src>

<mosaic_0001>
module attributes {stable_mosaic.version = 11 : i64} {
  func.func @_gemm_bias_kernel(%arg0: i32, %arg1: i32, %arg2: memref<512x128xf32, #tpu.memory_space<vmem>>, %arg3: memref<128x128xf32, #tpu.memory_space<vmem>>, %arg4: memref<1x128xf32, #tpu.memory_space<vmem>>, %arg5: memref<512x128xf32, #tpu.memory_space<vmem>>) attributes {dimension_semantics = [#tpu.dimension_semantics<parallel>, #tpu.dimension_semantics<parallel>], iteration_bounds = array<i64: 1, 1>, scalar_prefetch = 0 : i64, scratch_operands = 0 : i64, tpu.core_type = #tpu.core_type<tc>, window_params = [{transform_indices = @transform_0, window_bounds = array<i64: 512, 128>}, {transform_indices = @transform_1, window_bounds = array<i64: 128, 128>}, {transform_indices = @transform_2, window_bounds = array<i64: 1, 128>}, {transform_indices = @transform_3, window_bounds = array<i64: 512, 128>}]} {
    %c0 = arith.constant 0 : index
    %c0_0 = arith.constant 0 : index
    %0 = vector.load %arg2[%c0, %c0_0] : memref<512x128xf32, #tpu.memory_space<vmem>>, vector<512x128xf32>
    %c0_1 = arith.constant 0 : index
    %c0_2 = arith.constant 0 : index
    %1 = vector.load %arg3[%c0_1, %c0_2] : memref<128x128xf32, #tpu.memory_space<vmem>>, vector<128x128xf32>
    %cst = arith.constant dense<0.000000e+00> : vector<512x128xf32>
    %2 = tpu.matmul %0, %1, %cst {dimension_numbers = #tpu.dot_dimension_numbers<[1], [0], [0], [1], [0, 0, 1, 1], [], []>} : vector<512x128xf32>, vector<128x128xf32>, vector<512x128xf32> -> vector<512x128xf32>
    %c0_3 = arith.constant 0 : index
    %c0_4 = arith.constant 0 : index
    %3 = vector.load %arg4[%c0_3, %c0_4] : memref<1x128xf32, #tpu.memory_space<vmem>>, vector<1x128xf32>
    %4 = vector.broadcast %3 : vector<1x128xf32> to vector<512x128xf32>
    %5 = arith.addf %2, %4 : vector<512x128xf32>
    %c0_5 = arith.constant 0 : index
    %c0_6 = arith.constant 0 : index
    %6 = vector.load %arg5[%c0_5, %c0_6] : memref<512x128xf32, #tpu.memory_space<vmem>>, vector<512x128xf32>
    tpu.vector_store %arg5[%c0_5, %c0_6], %5 {strides = array<i32>} : memref<512x128xf32, #tpu.memory_space<vmem>>, vector<512x128xf32>,
    return
  }
  func.func @transform_0(%arg0: i32, %arg1: i32) -> (i32, i32) {
    %c0_i32 = arith.constant 0 : i32
    %c0_i32_0 = arith.constant 0 : i32
    return %arg1, %c0_i32 : i32, i32
  }
  func.func @transform_1(%arg0: i32, %arg1: i32) -> (i32, i32) {
    %c0_i32 = arith.constant 0 : i32
    %c0_i32_0 = arith.constant 0 : i32
    return %c0_i32, %arg0 : i32, i32
  }
  func.func @transform_2(%arg0: i32, %arg1: i32) -> (i32, i32) {
    %c0_i32 = arith.constant 0 : i32
    %c0_i32_0 = arith.constant 0 : i32
    return %c0_i32, %arg0 : i32, i32
  }
  func.func @transform_3(%arg0: i32, %arg1: i32) -> (i32, i32) {
    %c0_i32 = arith.constant 0 : i32
    return %arg1, %arg0 : i32, i32
  }
}

</mosaic_0001>

<bundles_post_ra>
// kernel: tpu_custom_call.1
= control target key start
LH: loop header
LB: loop body
LE: loop exit
PB: predicated region body
PF: predicated region fallthrough
CT: control target
= control target key end

     0   :  { %8 = vsyncpa [#allocation3], 0  ;;  %s1070_s0 = inlined_call_operand.hbm [shape: f32[512,128], index: 0, kind: input, shape index: {}]   ;;  %s1071_s1 = inlined_call_operand.hbm [shape: f32[128,128], index: 1, kind: input, shape index: {}]   ;;  %s1072_s2 = inlined_call_operand.vmem [shape: f32[1,128], index: 2, kind: input, shape index: {}]   ;;  %s1073_s3 = inlined_call_operand.hbm [shape: f32[512,128], index: 3, kind: output, shape index: {}]  }
   0x1   :  { %9 = vsyncpa [#allocation6], 0 }
   0x2   :  { %10 = vsyncpa [#allocation4], 0  ;;  %s931_s12 = smov [#allocation2]   ;;  %s859_s16 = scalar_lea.hbm %s1070_s0, 8192 }
   0x3   :  { %s16_s13 = sshll.u32 %s931_s12, 4  ;;  %p860_p0 = scmp.ne.s32.totalorder %s1070_s0, %s859_s16  ;;  %s17_s13 = int_to_ptr.vmem [resolvable:$true] %s16_s13 }
   0x4   :  { %p863_p1 = scmp.lt.u32.totalorder %s859_s16, %s1070_s0 }
   0x6   :  { %p865_p2 = pnand %p863_p1, %p860_p0 }
   0x8   :  { %868 = shalt.err (!%p865_p2)
}
   0x9   :  { %s869_s21 = scalar_lea.vmem %s17_s13, 8192  ;;  %p874_p4 = scmp.lt.s32.totalorder %s17_s13, %s17_s13 }
   0xa   :  { %p870_p3 = scmp.ne.s32.totalorder %s17_s13, %s869_s21  ;;  %p875_p5 = scmp.lt.s32.totalorder %s869_s21, %s869_s21 }
   0xc   :  { %p876_p6 = por %p875_p5, %p874_p4 }
   0xe   :  { %p877_p7 = pnand %p876_p6, %p870_p3 }
  0x10   :  { %880 = shalt.err (!%p877_p7)
}
  0x11   :  { %s932_s22 = smov 128   ;;  %s933_s23 = smov 8  }
  0x12   :  { %22 = dma.hbm_to_vmem [thread:$0]  %s1070_s0, 8192, %s17_s13, [#allocation3], %s932_s22, %s932_s22, %s933_s23  }
  0x13   :  { %s934_s26 = smov [#allocation5]   ;;  %s881_s30 = scalar_lea.hbm %s1071_s1, 2048 }
  0x14   :  { %s28_s27 = sshll.u32 %s934_s26, 4  ;;  %p882_p8 = scmp.ne.s32.totalorder %s1071_s1, %s881_s30  ;;  %s29_s27 = int_to_ptr.vmem [resolvable:$true] %s28_s27 }
  0x15   :  { %p885_p9 = scmp.lt.u32.totalorder %s881_s30, %s1071_s1 }
  0x17   :  { %p887_p10 = pnand %p885_p9, %p882_p8 }
  0x19   :  { %890 = shalt.err (!%p887_p10)
}
  0x1a   :  { %s891_s8 = scalar_lea.vmem %s29_s27, 2048  ;;  %p896_p12 = scmp.lt.s32.totalorder %s29_s27, %s29_s27 }
  0x1b   :  { %p892_p11 = scmp.ne.s32.totalorder %s29_s27, %s891_s8  ;;  %p897_p13 = scmp.lt.s32.totalorder %s891_s8, %s891_s8 }
  0x1d   :  { %p898_p0 = por %p897_p13, %p896_p12 }
  0x1f   :  { %p899_p1 = pnand %p898_p0, %p892_p11 }
  0x21   :  { %902 = shalt.err (!%p899_p1)
}
  0x22   :  { %34 = dma.hbm_to_vmem [thread:$0]  %s1071_s1, 2048, %s29_s27, [#allocation6], %s932_s22, %s932_s22, %s933_s23  }
  0x23   :  { %925 = dma.done.wait [#allocation3], 8192  }
  0x24   :  { %926 = vsyncadd [#allocation3], 4294959104 }
  0x25   :  { %927 = dma.done.wait [#allocation6], 2048  }
  0x26   :  { %928 = vsyncadd [#allocation6], 4294965248  ;;  %v107_v0 = vld [vmem:[#allocation5] sm:$0xff]  ;;  %v108_v1 = vld [vmem:[#allocation5 + $0x8] sm:$0xff] }
  0x27   :  { %v109_v2 = vld [vmem:[#allocation5 + $0x10] sm:$0xff]  ;;  %v806_v3 = vpack.c.bf16 %v108_v1, %v107_v0  ;;  %v110_v4 = vld [vmem:[#allocation5 + $0x18] sm:$0xff]  ;;  %v111_v6 = vld [vmem:[#allocation5 + $0x20] sm:$0xff] }
  0x28   :  { %v810_v5 = vpack.c.bf16 %v110_v4, %v109_v2  ;;  %v112_v7 = vld [vmem:[#allocation5 + $0x28] sm:$0xff]  ;;  %v43_v9 = vld [vmem:[#allocation2] sm:$0xff]  ;;  %v113_v11 = vld [vmem:[#allocation5 + $0x30] sm:$0xff] }
  0x29   :  { %807 = vmatprep.subr.bf16.mxu0 %v806_v3  ;;  %838 = vmatprep.subr.bf16.mxu1 %v806_v3  ;;  %v814_v8 = vpack.c.bf16 %v112_v7, %v111_v6  ;;  %v75_v10 = vld [vmem:[#allocation2 + $0x100] sm:$0xff]  ;;  %v114_v12 = vld [vmem:[#allocation5 + $0x38] sm:$0xff]  ;;  %v116_v15 = vld [vmem:[#allocation5 + $0x48] sm:$0xff] }
  0x2a   :  { %809 = vmatpush3.bf16.msra.mxu0 %v806_v3  ;;  %846 = vmatpush3.bf16.msra.mxu1 %v806_v3  ;;  %v818_v13 = vpack.c.bf16 %v114_v12, %v113_v11  ;;  %v115_v14 = vld [vmem:[#allocation5 + $0x40] sm:$0xff]  ;;  %v117_v17 = vld [vmem:[#allocation5 + $0x50] sm:$0xff]  ;;  %v118_v18 = vld [vmem:[#allocation5 + $0x58] sm:$0xff] }
  0x2b   :  { %811 = vmatprep.subr.bf16.mxu0 %v810_v5  ;;  %839 = vmatprep.subr.bf16.mxu1 %v810_v5  ;;  %v822_v16 = vpack.c.bf16 %v116_v15, %v115_v14  ;;  %v826_v19 = vpack.c.bf16 %v118_v18, %v117_v17  ;;  %v119_v20 = vld [vmem:[#allocation5 + $0x60] sm:$0xff]  ;;  %v120_v21 = vld [vmem:[#allocation5 + $0x68] sm:$0xff]  ;;  %v121_v23 = vld [vmem:[#allocation5 + $0x70] sm:$0xff] }
  0x2c   :  { %710 = vmatprep.mubr.f32.mxu0 %v43_v9  ;;  %758 = vmatprep.mubr.f32.mxu1 %v75_v10  ;;  %v830_v22 = vpack.c.bf16 %v120_v21, %v119_v20  ;;  %v122_v24 = vld [vmem:[#allocation5 + $0x78] sm:$0xff]  ;;  %v44_v26 = vld [vmem:[#allocation2 + $0x8] sm:$0xff]  ;;  %v45_v28 = vld [vmem:[#allocation2 + $0x10] sm:$0xff] }
  0x2d   :  { %v834_v25 = vpack.c.bf16 %v122_v24, %v121_v23  ;;  %v76_v27 = vld [vmem:[#allocation2 + $0x108] sm:$0xff]  ;;  %v77_v29 = vld [vmem:[#allocation2 + $0x110] sm:$0xff]  ;;  %v46_v30 = vld [vmem:[#allocation2 + $0x18] sm:$0xff] }
  0x2e   :  { %813 = vmatpush3.bf16.msra.mxu0 %v810_v5  ;;  %847 = vmatpush3.bf16.msra.mxu1 %v810_v5  ;;  %v78_v31 = vld [vmem:[#allocation2 + $0x118] sm:$0xff]  ;;  %v47_v32 = vld [vmem:[#allocation2 + $0x20] sm:$0xff]  ;;  %v48_v34 = vld [vmem:[#allocation2 + $0x28] sm:$0xff] }
  0x2f   :  { %815 = vmatprep.subr.bf16.mxu0 %v814_v8  ;;  %840 = vmatprep.subr.bf16.mxu1 %v814_v8  ;;  %v79_v33 = vld [vmem:[#allocation2 + $0x120] sm:$0xff]  ;;  %v80_v35 = vld [vmem:[#allocation2 + $0x128] sm:$0xff]  ;;  %v49_v36 = vld [vmem:[#allocation2 + $0x30] sm:$0xff] }
  0x30   :  { %v81_v37 = vld [vmem:[#allocation2 + $0x130] sm:$0xff]  ;;  %v50_v38 = vld [vmem:[#allocation2 + $0x38] sm:$0xff]  ;;  %v51_v40 = vld [vmem:[#allocation2 + $0x40] sm:$0xff] }
  0x31   :  { %v82_v39 = vld [vmem:[#allocation2 + $0x138] sm:$0xff]  ;;  %v83_v41 = vld [vmem:[#allocation2 + $0x140] sm:$0xff]  ;;  %v52_v42 = vld [vmem:[#allocation2 + $0x48] sm:$0xff] }
  0x32   :  { %817 = vmatpush3.bf16.msra.mxu0 %v814_v8  ;;  %848 = vmatpush3.bf16.msra.mxu1 %v814_v8  ;;  %v84_v43 = vld [vmem:[#allocation2 + $0x148] sm:$0xff]  ;;  %v53_v44 = vld [vmem:[#allocation2 + $0x50] sm:$0xff]  ;;  %v54_v46 = vld [vmem:[#allocation2 + $0x58] sm:$0xff] }
  0x33   :  { %819 = vmatprep.subr.bf16.mxu0 %v818_v13  ;;  %841 = vmatprep.subr.bf16.mxu1 %v818_v13  ;;  %v85_v45 = vld [vmem:[#allocation2 + $0x150] sm:$0xff]  ;;  %v86_v47 = vld [vmem:[#allocation2 + $0x158] sm:$0xff]  ;;  %v55_v48 = vld [vmem:[#allocation2 + $0x60] sm:$0xff] }
  0x34   :  { %v87_v49 = vld [vmem:[#allocation2 + $0x160] sm:$0xff]  ;;  %v56_v50 = vld [vmem:[#allocation2 + $0x68] sm:$0xff]  ;;  %v57_v52 = vld [vmem:[#allocation2 + $0x70] sm:$0xff] }
  0x35   :  { %v88_v51 = vld [vmem:[#allocation2 + $0x168] sm:$0xff]  ;;  %v89_v53 = vld [vmem:[#allocation2 + $0x170] sm:$0xff]  ;;  %v58_v54 = vld [vmem:[#allocation2 + $0x78] sm:$0xff] }
  0x36   :  { %821 = vmatpush3.bf16.msra.mxu0 %v818_v13  ;;  %849 = vmatpush3.bf16.msra.mxu1 %v818_v13  ;;  %v90_v55 = vld [vmem:[#allocation2 + $0x178] sm:$0xff]  ;;  %v59_v56 = vld [vmem:[#allocation2 + $0x80] sm:$0xff]  ;;  %v60_v58 = vld [vmem:[#allocation2 + $0x88] sm:$0xff] }
  0x37   :  { %823 = vmatprep.subr.bf16.mxu0 %v822_v16  ;;  %842 = vmatprep.subr.bf16.mxu1 %v822_v16  ;;  %v91_v57 = vld [vmem:[#allocation2 + $0x180] sm:$0xff]  ;;  %v92_v59 = vld [vmem:[#allocation2 + $0x188] sm:$0xff]  ;;  %v61_v60 = vld [vmem:[#allocation2 + $0x90] sm:$0xff] }
  0x38   :  { %v93_v61 = vld [vmem:[#allocation2 + $0x190] sm:$0xff]  ;;  %v62_v62 = vld [vmem:[#allocation2 + $0x98] sm:$0xff]  ;;  %v63_v0 = vld [vmem:[#allocation2 + $0xa0] sm:$0xff] }
  0x39   :  { %v94_v63 = vld [vmem:[#allocation2 + $0x198] sm:$0xff]  ;;  %v95_v1 = vld [vmem:[#allocation2 + $0x1a0] sm:$0xff]  ;;  %v64_v2 = vld [vmem:[#allocation2 + $0xa8] sm:$0xff] }
  0x3a   :  { %825 = vmatpush3.bf16.msra.mxu0 %v822_v16  ;;  %850 = vmatpush3.bf16.msra.mxu1 %v822_v16  ;;  %v96_v3 = vld [vmem:[#allocation2 + $0x1a8] sm:$0xff]  ;;  %v65_v4 = vld [vmem:[#allocation2 + $0xb0] sm:$0xff]  ;;  %v66_v6 = vld [vmem:[#allocation2 + $0xb8] sm:$0xff] }
  0x3b   :  { %827 = vmatprep.subr.bf16.mxu0 %v826_v19  ;;  %843 = vmatprep.subr.bf16.mxu1 %v826_v19  ;;  %v97_v5 = vld [vmem:[#allocation2 + $0x1b0] sm:$0xff]  ;;  %v98_v7 = vld [vmem:[#allocation2 + $0x1b8] sm:$0xff]  ;;  %v67_v8 = vld [vmem:[#allocation2 + $0xc0] sm:$0xff] }
  0x3c   :  { %v99_v9 = vld [vmem:[#allocation2 + $0x1c0] sm:$0xff]  ;;  %v68_v10 = vld [vmem:[#allocation2 + $0xc8] sm:$0xff]  ;;  %v69_v12 = vld [vmem:[#allocation2 + $0xd0] sm:$0xff] }
  0x3d   :  { %v100_v11 = vld [vmem:[#allocation2 + $0x1c8] sm:$0xff]  ;;  %v101_v13 = vld [vmem:[#allocation2 + $0x1d0] sm:$0xff]  ;;  %v70_v14 = vld [vmem:[#allocation2 + $0xd8] sm:$0xff] }
  0x3e   :  { %829 = vmatpush3.bf16.msra.mxu0 %v826_v19  ;;  %851 = vmatpush3.bf16.msra.mxu1 %v826_v19  ;;  %v102_v15 = vld [vmem:[#allocation2 + $0x1d8] sm:$0xff]  ;;  %v71_v16 = vld [vmem:[#allocation2 + $0xe0] sm:$0xff]  ;;  %v72_v18 = vld [vmem:[#allocation2 + $0xe8] sm:$0xff] }
  0x3f   :  { %831 = vmatprep.subr.bf16.mxu0 %v830_v22  ;;  %844 = vmatprep.subr.bf16.mxu1 %v830_v22  ;;  %v103_v17 = vld [vmem:[#allocation2 + $0x1e0] sm:$0xff]  ;;  %v104_v19 = vld [vmem:[#allocation2 + $0x1e8] sm:$0xff]  ;;  %v73_v20 = vld [vmem:[#allocation2 + $0xf0] sm:$0xff] }
  0x40   :  { %v105_v21 = vld [vmem:[#allocation2 + $0x1f0] sm:$0xff]  ;;  %v106_v23 = vld [vmem:[#allocation2 + $0x1f8] sm:$0xff]  ;;  %v989_v24 = vld [vmem:[%s1072_s2] ss:$0 sm:$0xff]  ;;  %s935_s2 = smov [#allocation7]  }
  0x41   :  { %s584_s11 = sshll.u32 %s935_s2, 4  ;;  %s585_s11 = int_to_ptr.vmem [resolvable:$true] %s584_s11 }
  0x42   :  { %833 = vmatpush3.bf16.msra.mxu0 %v830_v22  ;;  %852 = vmatpush3.bf16.msra.mxu1 %v830_v22  ;;  %v74_v22 = vld [vmem:[#allocation2 + $0xf8] sm:$0xff]  ;;  %s903_s12 = scalar_lea.vmem %s585_s11, 8192  ;;  %p908_p3 = scmp.lt.s32.totalorder %s585_s11, %s585_s11 }
  0x43   :  { %835 = vmatprep.subr.bf16.mxu0 %v834_v25  ;;  %845 = vmatprep.subr.bf16.mxu1 %v834_v25  ;;  %p904_p2 = scmp.ne.s32.totalorder %s585_s11, %s903_s12  ;;  %p909_p4 = scmp.lt.s32.totalorder %s903_s12, %s903_s12 }
  0x45   :  { %p910_p5 = por %p909_p4, %p908_p3 }
  0x46   :  { %837 = vmatpush3.bf16.msra.mxu0 %v834_v25  ;;  %853 = vmatpush3.bf16.msra.mxu1 %v834_v25 }
  0x47   :  { %p911_p6 = pnand %p910_p5, %p904_p2 }
  0x49   :  { %711 = vmatmul.mubr.f32.vlgmr.msra.gmra.mrb[0].mxu0 %v44_v26  ;;  %759 = vmatmul.mubr.f32.vlgmr.msra.gmra.mrb[0].mxu1 %v76_v27 }
  0x4a   :  { %713 = vmatprep.mubr.f32.mxu0 %v45_v28  ;;  %761 = vmatprep.mubr.f32.mxu1 %v77_v29 }
  0x4d   :  { %714 = vmatmul.mubr.f32.gmra.mrb[2].mxu0 %v46_v30  ;;  %762 = vmatmul.mubr.f32.gmra.mrb[2].mxu1 %v78_v31 }
  0x4e   :  { %716 = vmatprep.mubr.f32.mxu0 %v47_v32  ;;  %764 = vmatprep.mubr.f32.mxu1 %v79_v33 }
  0x51   :  { %717 = vmatmul.mubr.f32.gmra.mrb[4].mxu0 %v48_v34  ;;  %765 = vmatmul.mubr.f32.gmra.mrb[4].mxu1 %v80_v35 }
  0x52   :  { %719 = vmatprep.mubr.f32.mxu0 %v49_v36  ;;  %767 = vmatprep.mubr.f32.mxu1 %v81_v37 }
  0x55   :  { %720 = vmatmul.mubr.f32.gmra.mrb[6].mxu0 %v50_v38  ;;  %768 = vmatmul.mubr.f32.gmra.mrb[6].mxu1 %v82_v39 }
  0x56   :  { %722 = vmatprep.mubr.f32.mxu0 %v51_v40  ;;  %770 = vmatprep.mubr.f32.mxu1 %v83_v41 }
  0x59   :  { %723 = vmatmul.mubr.f32.gmra.mrb[8].mxu0 %v52_v42  ;;  %771 = vmatmul.mubr.f32.gmra.mrb[8].mxu1 %v84_v43 }
  0x5a   :  { %725 = vmatprep.mubr.f32.mxu0 %v53_v44  ;;  %773 = vmatprep.mubr.f32.mxu1 %v85_v45 }
  0x5d   :  { %726 = vmatmul.mubr.f32.gmra.mrb[10].mxu0 %v54_v46  ;;  %774 = vmatmul.mubr.f32.gmra.mrb[10].mxu1 %v86_v47 }
  0x5e   :  { %728 = vmatprep.mubr.f32.mxu0 %v55_v48  ;;  %776 = vmatprep.mubr.f32.mxu1 %v87_v49 }
  0x61   :  { %729 = vmatmul.mubr.f32.gmra.mrb[12].mxu0 %v56_v50  ;;  %777 = vmatmul.mubr.f32.gmra.mrb[12].mxu1 %v88_v51 }
  0x62   :  { %731 = vmatprep.mubr.f32.mxu0 %v57_v52  ;;  %779 = vmatprep.mubr.f32.mxu1 %v89_v53 }
  0x65   :  { %732 = vmatmul.mubr.f32.gmra.mrb[14].mxu0 %v58_v54  ;;  %780 = vmatmul.mubr.f32.gmra.mrb[14].mxu1 %v90_v55 }
  0x66   :  { %734 = vmatprep.mubr.f32.mxu0 %v59_v56  ;;  %782 = vmatprep.mubr.f32.mxu1 %v91_v57 }
  0x69   :  { %735 = vmatmul.mubr.f32.gmra.mrb[16].mxu0 %v60_v58  ;;  %783 = vmatmul.mubr.f32.gmra.mrb[16].mxu1 %v92_v59 }
  0x6a   :  { %737 = vmatprep.mubr.f32.mxu0 %v61_v60  ;;  %785 = vmatprep.mubr.f32.mxu1 %v93_v61 }
  0x6d   :  { %738 = vmatmul.mubr.f32.gmra.mrb[18].mxu0 %v62_v62  ;;  %786 = vmatmul.mubr.f32.gmra.mrb[18].mxu1 %v94_v63 }
  0x6e   :  { %740 = vmatprep.mubr.f32.mxu0 %v63_v0  ;;  %788 = vmatprep.mubr.f32.mxu1 %v95_v1 }
  0x71   :  { %741 = vmatmul.mubr.f32.gmra.mrb[20].mxu0 %v64_v2  ;;  %789 = vmatmul.mubr.f32.gmra.mrb[20].mxu1 %v96_v3 }
  0x72   :  { %743 = vmatprep.mubr.f32.mxu0 %v65_v4  ;;  %791 = vmatprep.mubr.f32.mxu1 %v97_v5 }
  0x75   :  { %744 = vmatmul.mubr.f32.gmra.mrb[22].mxu0 %v66_v6  ;;  %792 = vmatmul.mubr.f32.gmra.mrb[22].mxu1 %v98_v7 }
  0x76   :  { %746 = vmatprep.mubr.f32.mxu0 %v67_v8  ;;  %794 = vmatprep.mubr.f32.mxu1 %v99_v9 }
  0x79   :  { %747 = vmatmul.mubr.f32.gmra.mrb[24].mxu0 %v68_v10  ;;  %795 = vmatmul.mubr.f32.gmra.mrb[24].mxu1 %v100_v11 }
  0x7a   :  { %749 = vmatprep.mubr.f32.mxu0 %v69_v12  ;;  %797 = vmatprep.mubr.f32.mxu1 %v101_v13 }
  0x7d   :  { %750 = vmatmul.mubr.f32.gmra.mrb[26].mxu0 %v70_v14  ;;  %798 = vmatmul.mubr.f32.gmra.mrb[26].mxu1 %v102_v15 }
  0x7e   :  { %752 = vmatprep.mubr.f32.mxu0 %v71_v16  ;;  %800 = vmatprep.mubr.f32.mxu1 %v103_v17 }
  0x81   :  { %753 = vmatmul.mubr.f32.gmra.mrb[28].mxu0 %v72_v18  ;;  %801 = vmatmul.mubr.f32.gmra.mrb[28].mxu1 %v104_v19 }
  0x82   :  { %755 = vmatprep.mubr.f32.mxu0 %v73_v20  ;;  %803 = vmatprep.mubr.f32.mxu1 %v105_v21 }
  0x85   :  { %756 = vmatmul.mubr.f32.gmra.mrb[30].mxu0 %v74_v22  ;;  %804 = vmatmul.mubr.f32.gmra.mrb[30].mxu1 %v106_v23 }
 0x11c   :  { %v712_v25 = vpop.f32.mrb[0].mxu0  ;;  %v760_v26 = vpop.f32.mrb[0].mxu1 }
 0x11d   :  { %v202_v27 = vadd.f32 %v712_v25, %v989_v24  ;;  %v362_v28 = vadd.f32 %v760_v26, %v989_v24  ;;  %v196_v29 = vpop.f32.mrb[1].mxu0  ;;  %v356_v30 = vpop.f32.mrb[1].mxu1 }
 0x11e   :  { %v197_v31 = vadd.f32 %v989_v24, %v196_v29  ;;  %v357_v32 = vadd.f32 %v989_v24, %v356_v30 }
 0x11f   :  { %516 = vst [vmem:[#allocation7 + $0x8] sm:$0xff] %v202_v27  ;;  %548 = vst [vmem:[#allocation7 + $0x108] sm:$0xff] %v362_v28 }
 0x120   :  { %515 = vst [vmem:[#allocation7] sm:$0xff] %v197_v31  ;;  %547 = vst [vmem:[#allocation7 + $0x100] sm:$0xff] %v357_v32  ;;  %v715_v33 = vpop.f32.mrb[2].mxu0  ;;  %v763_v34 = vpop.f32.mrb[2].mxu1 }
 0x121   :  { %v212_v35 = vadd.f32 %v715_v33, %v989_v24  ;;  %v372_v36 = vadd.f32 %v763_v34, %v989_v24  ;;  %v206_v37 = vpop.f32.mrb[3].mxu0  ;;  %v366_v38 = vpop.f32.mrb[3].mxu1 }
 0x122   :  { %v207_v39 = vadd.f32 %v989_v24, %v206_v37  ;;  %v367_v40 = vadd.f32 %v989_v24, %v366_v38 }
 0x123   :  { %518 = vst [vmem:[#allocation7 + $0x18] sm:$0xff] %v212_v35  ;;  %550 = vst [vmem:[#allocation7 + $0x118] sm:$0xff] %v372_v36 }
 0x124   :  { %517 = vst [vmem:[#allocation7 + $0x10] sm:$0xff] %v207_v39  ;;  %549 = vst [vmem:[#allocation7 + $0x110] sm:$0xff] %v367_v40  ;;  %v718_v41 = vpop.f32.mrb[4].mxu0  ;;  %v766_v42 = vpop.f32.mrb[4].mxu1 }
 0x125   :  { %v222_v43 = vadd.f32 %v718_v41, %v989_v24  ;;  %v382_v44 = vadd.f32 %v766_v42, %v989_v24  ;;  %v216_v45 = vpop.f32.mrb[5].mxu0  ;;  %v376_v46 = vpop.f32.mrb[5].mxu1 }
 0x126   :  { %v217_v47 = vadd.f32 %v989_v24, %v216_v45  ;;  %v377_v48 = vadd.f32 %v989_v24, %v376_v46 }
 0x127   :  { %520 = vst [vmem:[#allocation7 + $0x28] sm:$0xff] %v222_v43  ;;  %552 = vst [vmem:[#allocation7 + $0x128] sm:$0xff] %v382_v44 }
 0x128   :  { %519 = vst [vmem:[#allocation7 + $0x20] sm:$0xff] %v217_v47  ;;  %551 = vst [vmem:[#allocation7 + $0x120] sm:$0xff] %v377_v48  ;;  %v721_v49 = vpop.f32.mrb[6].mxu0  ;;  %v769_v50 = vpop.f32.mrb[6].mxu1 }
 0x129   :  { %v232_v51 = vadd.f32 %v721_v49, %v989_v24  ;;  %v392_v52 = vadd.f32 %v769_v50, %v989_v24  ;;  %v226_v53 = vpop.f32.mrb[7].mxu0  ;;  %v386_v54 = vpop.f32.mrb[7].mxu1 }
 0x12a   :  { %v227_v55 = vadd.f32 %v989_v24, %v226_v53  ;;  %v387_v56 = vadd.f32 %v989_v24, %v386_v54 }
 0x12b   :  { %522 = vst [vmem:[#allocation7 + $0x38] sm:$0xff] %v232_v51  ;;  %554 = vst [vmem:[#allocation7 + $0x138] sm:$0xff] %v392_v52 }
 0x12c   :  { %521 = vst [vmem:[#allocation7 + $0x30] sm:$0xff] %v227_v55  ;;  %553 = vst [vmem:[#allocation7 + $0x130] sm:$0xff] %v387_v56  ;;  %v724_v57 = vpop.f32.mrb[8].mxu0  ;;  %v772_v58 = vpop.f32.mrb[8].mxu1 }
 0x12d   :  { %v242_v59 = vadd.f32 %v724_v57, %v989_v24  ;;  %v402_v60 = vadd.f32 %v772_v58, %v989_v24  ;;  %v236_v61 = vpop.f32.mrb[9].mxu0  ;;  %v396_v62 = vpop.f32.mrb[9].mxu1 }
 0x12e   :  { %v237_v63 = vadd.f32 %v989_v24, %v236_v61  ;;  %v397_v0 = vadd.f32 %v989_v24, %v396_v62 }
 0x12f   :  { %524 = vst [vmem:[#allocation7 + $0x48] sm:$0xff] %v242_v59  ;;  %556 = vst [vmem:[#allocation7 + $0x148] sm:$0xff] %v402_v60 }
 0x130   :  { %523 = vst [vmem:[#allocation7 + $0x40] sm:$0xff] %v237_v63  ;;  %555 = vst [vmem:[#allocation7 + $0x140] sm:$0xff] %v397_v0  ;;  %v727_v1 = vpop.f32.mrb[10].mxu0  ;;  %v775_v2 = vpop.f32.mrb[10].mxu1 }
 0x131   :  { %v252_v3 = vadd.f32 %v727_v1, %v989_v24  ;;  %v412_v4 = vadd.f32 %v775_v2, %v989_v24  ;;  %v246_v5 = vpop.f32.mrb[11].mxu0  ;;  %v406_v6 = vpop.f32.mrb[11].mxu1 }
 0x132   :  { %v247_v7 = vadd.f32 %v989_v24, %v246_v5  ;;  %v407_v8 = vadd.f32 %v989_v24, %v406_v6 }
 0x133   :  { %526 = vst [vmem:[#allocation7 + $0x58] sm:$0xff] %v252_v3  ;;  %558 = vst [vmem:[#allocation7 + $0x158] sm:$0xff] %v412_v4 }
 0x134   :  { %525 = vst [vmem:[#allocation7 + $0x50] sm:$0xff] %v247_v7  ;;  %557 = vst [vmem:[#allocation7 + $0x150] sm:$0xff] %v407_v8  ;;  %v730_v9 = vpop.f32.mrb[12].mxu0  ;;  %v778_v10 = vpop.f32.mrb[12].mxu1 }
 0x135   :  { %v262_v11 = vadd.f32 %v730_v9, %v989_v24  ;;  %v422_v12 = vadd.f32 %v778_v10, %v989_v24  ;;  %v256_v13 = vpop.f32.mrb[13].mxu0  ;;  %v416_v14 = vpop.f32.mrb[13].mxu1 }
 0x136   :  { %v257_v15 = vadd.f32 %v989_v24, %v256_v13  ;;  %v417_v16 = vadd.f32 %v989_v24, %v416_v14 }
 0x137   :  { %528 = vst [vmem:[#allocation7 + $0x68] sm:$0xff] %v262_v11  ;;  %560 = vst [vmem:[#allocation7 + $0x168] sm:$0xff] %v422_v12 }
 0x138   :  { %527 = vst [vmem:[#allocation7 + $0x60] sm:$0xff] %v257_v15  ;;  %559 = vst [vmem:[#allocation7 + $0x160] sm:$0xff] %v417_v16  ;;  %v733_v17 = vpop.f32.mrb[14].mxu0  ;;  %v781_v18 = vpop.f32.mrb[14].mxu1 }
 0x139   :  { %v272_v19 = vadd.f32 %v733_v17, %v989_v24  ;;  %v432_v20 = vadd.f32 %v781_v18, %v989_v24  ;;  %v266_v21 = vpop.f32.mrb[15].mxu0  ;;  %v426_v22 = vpop.f32.mrb[15].mxu1 }
 0x13a   :  { %v267_v23 = vadd.f32 %v989_v24, %v266_v21  ;;  %v427_v25 = vadd.f32 %v989_v24, %v426_v22 }
 0x13b   :  { %530 = vst [vmem:[#allocation7 + $0x78] sm:$0xff] %v272_v19  ;;  %562 = vst [vmem:[#allocation7 + $0x178] sm:$0xff] %v432_v20 }
 0x13c   :  { %529 = vst [vmem:[#allocation7 + $0x70] sm:$0xff] %v267_v23  ;;  %561 = vst [vmem:[#allocation7 + $0x170] sm:$0xff] %v427_v25  ;;  %v736_v26 = vpop.f32.mrb[16].mxu0  ;;  %v784_v27 = vpop.f32.mrb[16].mxu1 }
 0x13d   :  { %v282_v28 = vadd.f32 %v736_v26, %v989_v24  ;;  %v442_v29 = vadd.f32 %v784_v27, %v989_v24  ;;  %v276_v30 = vpop.f32.mrb[17].mxu0  ;;  %v436_v31 = vpop.f32.mrb[17].mxu1 }
 0x13e   :  { %v277_v32 = vadd.f32 %v989_v24, %v276_v30  ;;  %v437_v33 = vadd.f32 %v989_v24, %v436_v31 }
 0x13f   :  { %532 = vst [vmem:[#allocation7 + $0x88] sm:$0xff] %v282_v28  ;;  %564 = vst [vmem:[#allocation7 + $0x188] sm:$0xff] %v442_v29 }
 0x140   :  { %531 = vst [vmem:[#allocation7 + $0x80] sm:$0xff] %v277_v32  ;;  %563 = vst [vmem:[#allocation7 + $0x180] sm:$0xff] %v437_v33  ;;  %v739_v34 = vpop.f32.mrb[18].mxu0  ;;  %v787_v35 = vpop.f32.mrb[18].mxu1 }
 0x141   :  { %v292_v36 = vadd.f32 %v739_v34, %v989_v24  ;;  %v452_v37 = vadd.f32 %v787_v35, %v989_v24  ;;  %v286_v38 = vpop.f32.mrb[19].mxu0  ;;  %v446_v39 = vpop.f32.mrb[19].mxu1 }
 0x142   :  { %v287_v40 = vadd.f32 %v989_v24, %v286_v38  ;;  %v447_v41 = vadd.f32 %v989_v24, %v446_v39 }
 0x143   :  { %534 = vst [vmem:[#allocation7 + $0x98] sm:$0xff] %v292_v36  ;;  %566 = vst [vmem:[#allocation7 + $0x198] sm:$0xff] %v452_v37 }
 0x144   :  { %533 = vst [vmem:[#allocation7 + $0x90] sm:$0xff] %v287_v40  ;;  %565 = vst [vmem:[#allocation7 + $0x190] sm:$0xff] %v447_v41  ;;  %v742_v42 = vpop.f32.mrb[20].mxu0  ;;  %v790_v43 = vpop.f32.mrb[20].mxu1 }
 0x145   :  { %v302_v44 = vadd.f32 %v742_v42, %v989_v24  ;;  %v462_v45 = vadd.f32 %v790_v43, %v989_v24  ;;  %v296_v46 = vpop.f32.mrb[21].mxu0  ;;  %v456_v47 = vpop.f32.mrb[21].mxu1 }
 0x146   :  { %v297_v48 = vadd.f32 %v989_v24, %v296_v46  ;;  %v457_v49 = vadd.f32 %v989_v24, %v456_v47 }
 0x147   :  { %536 = vst [vmem:[#allocation7 + $0xa8] sm:$0xff] %v302_v44  ;;  %568 = vst [vmem:[#allocation7 + $0x1a8] sm:$0xff] %v462_v45 }
 0x148   :  { %535 = vst [vmem:[#allocation7 + $0xa0] sm:$0xff] %v297_v48  ;;  %567 = vst [vmem:[#allocation7 + $0x1a0] sm:$0xff] %v457_v49  ;;  %v745_v50 = vpop.f32.mrb[22].mxu0  ;;  %v793_v51 = vpop.f32.mrb[22].mxu1 }
 0x149   :  { %v312_v52 = vadd.f32 %v745_v50, %v989_v24  ;;  %v472_v53 = vadd.f32 %v793_v51, %v989_v24  ;;  %v306_v54 = vpop.f32.mrb[23].mxu0  ;;  %v466_v55 = vpop.f32.mrb[23].mxu1 }
 0x14a   :  { %v307_v56 = vadd.f32 %v989_v24, %v306_v54  ;;  %v467_v57 = vadd.f32 %v989_v24, %v466_v55 }
 0x14b   :  { %538 = vst [vmem:[#allocation7 + $0xb8] sm:$0xff] %v312_v52  ;;  %570 = vst [vmem:[#allocation7 + $0x1b8] sm:$0xff] %v472_v53 }
 0x14c   :  { %537 = vst [vmem:[#allocation7 + $0xb0] sm:$0xff] %v307_v56  ;;  %569 = vst [vmem:[#allocation7 + $0x1b0] sm:$0xff] %v467_v57  ;;  %v748_v58 = vpop.f32.mrb[24].mxu0  ;;  %v796_v59 = vpop.f32.mrb[24].mxu1 }
 0x14d   :  { %v322_v60 = vadd.f32 %v748_v58, %v989_v24  ;;  %v482_v61 = vadd.f32 %v796_v59, %v989_v24  ;;  %v316_v62 = vpop.f32.mrb[25].mxu0  ;;  %v476_v63 = vpop.f32.mrb[25].mxu1 }
 0x14e   :  { %v317_v0 = vadd.f32 %v989_v24, %v316_v62  ;;  %v477_v1 = vadd.f32 %v989_v24, %v476_v63 }
 0x14f   :  { %540 = vst [vmem:[#allocation7 + $0xc8] sm:$0xff] %v322_v60  ;;  %572 = vst [vmem:[#allocation7 + $0x1c8] sm:$0xff] %v482_v61 }
 0x150   :  { %539 = vst [vmem:[#allocation7 + $0xc0] sm:$0xff] %v317_v0  ;;  %571 = vst [vmem:[#allocation7 + $0x1c0] sm:$0xff] %v477_v1  ;;  %v751_v2 = vpop.f32.mrb[26].mxu0  ;;  %v799_v3 = vpop.f32.mrb[26].mxu1 }
 0x151   :  { %v332_v4 = vadd.f32 %v751_v2, %v989_v24  ;;  %v492_v5 = vadd.f32 %v799_v3, %v989_v24  ;;  %v326_v6 = vpop.f32.mrb[27].mxu0  ;;  %v486_v7 = vpop.f32.mrb[27].mxu1 }
 0x152   :  { %v327_v8 = vadd.f32 %v989_v24, %v326_v6  ;;  %v487_v9 = vadd.f32 %v989_v24, %v486_v7 }
 0x153   :  { %542 = vst [vmem:[#allocation7 + $0xd8] sm:$0xff] %v332_v4  ;;  %574 = vst [vmem:[#allocation7 + $0x1d8] sm:$0xff] %v492_v5 }
 0x154   :  { %541 = vst [vmem:[#allocation7 + $0xd0] sm:$0xff] %v327_v8  ;;  %573 = vst [vmem:[#allocation7 + $0x1d0] sm:$0xff] %v487_v9  ;;  %v754_v10 = vpop.f32.mrb[28].mxu0  ;;  %v802_v11 = vpop.f32.mrb[28].mxu1 }
 0x155   :  { %v342_v12 = vadd.f32 %v754_v10, %v989_v24  ;;  %v502_v13 = vadd.f32 %v802_v11, %v989_v24  ;;  %v336_v14 = vpop.f32.mrb[29].mxu0  ;;  %v496_v15 = vpop.f32.mrb[29].mxu1 }
 0x156   :  { %v337_v16 = vadd.f32 %v989_v24, %v336_v14  ;;  %v497_v17 = vadd.f32 %v989_v24, %v496_v15 }
 0x157   :  { %544 = vst [vmem:[#allocation7 + $0xe8] sm:$0xff] %v342_v12  ;;  %576 = vst [vmem:[#allocation7 + $0x1e8] sm:$0xff] %v502_v13 }
 0x158   :  { %543 = vst [vmem:[#allocation7 + $0xe0] sm:$0xff] %v337_v16  ;;  %575 = vst [vmem:[#allocation7 + $0x1e0] sm:$0xff] %v497_v17  ;;  %v757_v18 = vpop.f32.mrb[30].mxu0  ;;  %v805_v19 = vpop.f32.mrb[30].mxu1 }
 0x159   :  { %v352_v20 = vadd.f32 %v757_v18, %v989_v24  ;;  %v512_v21 = vadd.f32 %v805_v19, %v989_v24  ;;  %v346_v22 = vpop.f32.mrb[31].mxu0  ;;  %v506_v23 = vpop.f32.mrb[31].mxu1 }
 0x15a   :  { %v347_v25 = vadd.f32 %v989_v24, %v346_v22  ;;  %v507_v26 = vadd.f32 %v989_v24, %v506_v23 }
 0x15b   :  { %546 = vst [vmem:[#allocation7 + $0xf8] sm:$0xff] %v352_v20  ;;  %578 = vst [vmem:[#allocation7 + $0x1f8] sm:$0xff] %v512_v21 }
 0x15c   :  { %545 = vst [vmem:[#allocation7 + $0xf0] sm:$0xff] %v347_v25  ;;  %577 = vst [vmem:[#allocation7 + $0x1f0] sm:$0xff] %v507_v26 }
 0x15d   :  { %914 = shalt.err (!%p911_p6)
}
 0x15e   :  { %s915_s15 = scalar_lea.hbm %s1073_s3, 8192 }
 0x15f   :  { %p916_p7 = scmp.ne.s32.totalorder %s1073_s3, %s915_s15  ;;  %p919_p8 = scmp.lt.u32.totalorder %s915_s15, %s1073_s3 }
 0x161   :  { %p921_p9 = pnand %p919_p8, %p916_p7 }
 0x163   :  { %924 = shalt.err (!%p921_p9)
}
 0x164   :  { %590 = dma.vmem_to_hbm [thread:$0]  %s585_s11, 8192, %s1073_s3, [#allocation4], %s932_s22, %s932_s22, %s933_s23  }
 0x165   :  { %929 = dma.done.wait [#allocation4], 8192  }
 0x166   :  { %930 = vsyncadd [#allocation4], 4294959104 }
 0x167   :  { %594 = vsyncpa [#allocation3], 1 }
 0x168   :  { %595 = vsyncpa [#allocation6], 1 }
 0x169   :  { %596 = vsyncpa [#allocation4], 1 }

</bundles_post_ra>
